<compile_context>
chip_gen: v7x
topology: tpu7x:2x2x1
jax: 0.10.0
libtpu: 0.0.40
codegen_flags: <defaults>
</compile_context>

<pallas_src>
import functools

import jax
import jax.numpy as jnp
from jax.experimental import pallas as pl
from jax.experimental.pallas import tpu as pltpu


# ---------------------------------------------------------------------------
# Pallas kernel: full-K fused GEMM with optional bn+ReLU and residual epilogues
# ---------------------------------------------------------------------------

def _fused_mm_kernel(*refs, has_res, has_bn):
    """refs = (a, b, [residual], [bn_pack], out)."""
    it = iter(refs)
    a_ref = next(it)                       # (TM, Kp)  bf16
    b_ref = next(it)                       # (Kp, Np)  bf16, VMEM-resident (constant block index)
    r_ref = next(it) if has_res else None  # (TM, Np)  bf16
    bn_ref = next(it) if has_bn else None  # (2, Np)   f32  (row 0 = scale, row 1 = shift)
    o_ref = next(it)                       # (TM, Np)  bf16 or f32

    out = jnp.dot(a_ref[...], b_ref[...], preferred_element_type=jnp.float32)
    if has_bn:      # fused bn2 + ReLU (per-output-channel affine)
        out = jnp.maximum(out * bn_ref[0:1, :] + bn_ref[1:2, :], 0.0)
    if has_res:     # fused residual add (sum stays f32 in-register)
        out = out + r_ref[...].astype(jnp.float32)
    o_ref[...] = out.astype(o_ref.dtype)


def _round_up(x, m):
    return (x + m - 1) // m * m


def _pad2(x, rows, cols):
    r, c = x.shape
    if r == rows and c == cols:
        return x
    return jnp.pad(x, ((0, rows - r), (0, cols - c)))


def fused_matmul(a, b_pad, n_out, *, residual=None, bn_pack=None,
                 out_dtype=jnp.float32):
    """epilogue(a @ b_pad)[:M, :n_out].

    a        : [M, K] activations / im2col patches (cast to bf16; K <= Kp).
    b_pad    : [Kp, Np] bf16 weights, pre-padded at init (Kp, Np multiples of 128).
    bn_pack  : optional (2, Np) f32 -> relu(x * bn_pack[0] + bn_pack[1]) epilogue.
    residual : optional [M, n_out] added after the epilogue (upcast from bf16).
    """
    M, K = a.shape
    Kp, Np = b_pad.shape
    assert K <= Kp and Kp % 128 == 0 and Np % 128 == 0 and n_out <= Np
    has_res = residual is not None
    has_bn = bn_pack is not None
    out_bytes = jnp.dtype(out_dtype).itemsize

    # ---- TM selection: largest 16-aligned tile fitting a ~36 MiB double-buffered
    #      footprint (leaves headroom under the 48 MiB limit / v7x's 64 MiB VMEM).
    budget = 36 * 1024 * 1024
    M_al = _round_up(M, 16)                 # 16-aligned sublanes (bf16-packed tiles)
    TM = 16
    for cand in sorted({1024, 512, 256, 128, 64, 32, 16, M_al}, reverse=True):
        if cand > M_al or cand > 1024:
            continue
        fp = (2 * cand * Kp * 2                       # A tiles, bf16, double buffered
              + 2 * Kp * Np * 2                       # resident weights (counted x2)
              + (2 * cand * Np * 2 if has_res else 0)  # residual tiles
              + 2 * cand * Np * out_bytes             # output tiles
              + cand * Np * 4)                        # in-flight f32 matmul result
        if fp <= budget:
            TM = cand
            break
    Mp = _round_up(M, TM)
    # v7x has 2 TensorCores: keep at least 2 parallel M-tiles when M is large enough.
    if Mp // TM < 2 and TM in (1024, 512, 256):
        TM //= 2
        Mp = _round_up(M, TM)
    nm = Mp // TM

    a_p = _pad2(a.astype(jnp.bfloat16), Mp, Kp)

    inputs = [a_p, b_pad]
    in_specs = [
        pl.BlockSpec((TM, Kp), lambda i: (i, 0)),
        # Constant block index: weights DMA'd once, stay resident in VMEM.
        pl.BlockSpec((Kp, Np), lambda i: (0, 0)),
    ]
    if has_res:
        inputs.append(_pad2(residual.astype(jnp.bfloat16), Mp, Np))
        in_specs.append(pl.BlockSpec((TM, Np), lambda i: (i, 0)))
    if has_bn:
        inputs.append(bn_pack)
        in_specs.append(pl.BlockSpec((2, Np), lambda i: (0, 0)))

    kernel = functools.partial(_fused_mm_kernel, has_res=has_res, has_bn=has_bn)

    out = pl.pallas_call(
        kernel,
        out_shape=jax.ShapeDtypeStruct((Mp, Np), out_dtype),
        grid_spec=pltpu.PrefetchScalarGridSpec(
            num_scalar_prefetch=0,
            grid=(nm,),
            in_specs=in_specs,
            out_specs=pl.BlockSpec((TM, Np), lambda i: (i, 0)),
        ),
        compiler_params=pltpu.CompilerParams(
            dimension_semantics=("parallel",),
            # Safe on v7x (64 MiB physical); generous headroom on v5e/v6e (128 MiB).
            vmem_limit_bytes=48 * 1024 * 1024,
        ),
    )(*inputs)

    return out[:M, :n_out]


# ---------------------------------------------------------------------------
# Glue: im2col, weight packing, block / network composition (plain JAX)
# ---------------------------------------------------------------------------

def im2col_3x3(x_nhwc, stride):
    """3x3, padding=1 patch extraction. Returns ([N*Ho*Wo, 9*C], Ho, Wo). Keeps dtype."""
    N, H, W, C = x_nhwc.shape
    Ho = (H + 2 - 3) // stride + 1
    Wo = (W + 2 - 3) // stride + 1
    xp = jnp.pad(x_nhwc, ((0, 0), (1, 1), (1, 1), (0, 0)))
    cols = []
    for dy in range(3):
        for dx in range(3):
            cols.append(xp[:,
                           dy: dy + (Ho - 1) * stride + 1: stride,
                           dx: dx + (Wo - 1) * stride + 1: stride,
                           :])
    patches = jnp.concatenate(cols, axis=-1)            # (dy, dx, c) ordering
    return patches.reshape(N * Ho * Wo, 9 * C), Ho, Wo


def _w_to_mat(w):
    """PyTorch conv weight [Co, Ci, kh, kw] -> matmul weight [kh*kw*Ci, Co] (f32)."""
    Co, Ci, kh, kw = w.shape
    return jnp.transpose(w, (2, 3, 1, 0)).reshape(kh * kw * Ci, Co)


def _pad_weight(wm, n_pad):
    """Pad [K, Co] -> [round_up(K,128), n_pad] and cast to bf16 (done once at init)."""
    K, Co = wm.shape
    Kp = _round_up(K, 128)
    return jnp.pad(wm, ((0, Kp - K), (0, n_pad - Co))).astype(jnp.bfloat16)


def _pack_bn(scale, shift, n_pad):
    """Pack per-channel scale/shift into one (2, n_pad) f32 array (one BlockSpec)."""
    c = scale.shape[0]
    return jnp.stack([
        jnp.pad(scale.astype(jnp.float32), (0, n_pad - c)),
        jnp.pad(shift.astype(jnp.float32), (0, n_pad - c)),
    ])


def basic_block_forward(x, p, stride, equal_in_out, out_planes):
    """One pre-activation BasicBlock. x: NHWC float32."""
    N, H, W, Ci = x.shape
    if equal_in_out and stride != 1:
        # WRN never configures this; the identity residual would be shape-mismatched.
        raise ValueError("equalInOut BasicBlock with stride > 1 is not supported")

    # bn1 + relu (folded affine, f32) -> cast to bf16 before im2col (halves HBM).
    a = jnp.maximum(x * p["bn1_scale"] + p["bn1_shift"], 0.0).astype(jnp.bfloat16)

    # conv1 (3x3, stride) with bn2+ReLU fused as the GEMM epilogue; bf16 output
    # (it is only consumed by the conv2 im2col).
    patches1, Ho, Wo = im2col_3x3(a, stride)
    M = N * Ho * Wo
    out1 = fused_matmul(patches1, p["w1"], out_planes,
                        bn_pack=p["bn2_pack"], out_dtype=jnp.bfloat16)
    out1 = out1.reshape(N, Ho, Wo, out_planes)

    # conv2 (3x3, stride 1).  dropRate = 0.0 -> dropout is a no-op.
    patches2, _, _ = im2col_3x3(out1, 1)
    if equal_in_out:
        # Identity residual, added in the GEMM epilogue (passed as bf16).
        res = x.reshape(M, Ci)
        y2d = fused_matmul(patches2, p["w2"], out_planes,
                           residual=res, out_dtype=jnp.float32)
    else:
        # 1x1 strided shortcut fused into the same GEMM via K-concatenation:
        # [patches2 | a_sub] @ [[W2],[W_sc]]  = conv2(out1) + shortcut(a).
        a_sub = a[:, ::stride, ::stride, :].reshape(M, Ci)
        a2 = jnp.concatenate([patches2, a_sub], axis=-1)
        y2d = fused_matmul(a2, p["w2"], out_planes, out_dtype=jnp.float32)

    return y2d.reshape(N, Ho, Wo, out_planes)


@functools.partial(jax.jit, static_argnums=(2, 3, 4))
def network_block_forward(x_nchw, params, stride, in_planes, out_planes):
    # NCHW -> NHWC once for the whole NetworkBlock (hoisted transposes).
    out = jnp.transpose(x_nchw, (0, 2, 3, 1))
    for i, p in enumerate(params):
        s = stride if i == 0 else 1
        equal = (in_planes if i == 0 else out_planes) == out_planes
        out = basic_block_forward(out, p, s, equal, out_planes)
    return jnp.transpose(out, (0, 3, 1, 2))


# ---------------------------------------------------------------------------
# Deterministic parameter init (shapes follow BasicBlock.__init__)
# ---------------------------------------------------------------------------

def _bn_fold(key, c):
    k1, k2, k3, k4 = jax.random.split(key, 4)
    gamma = 1.0 + 0.1 * jax.random.normal(k1, (c,))
    beta = 0.1 * jax.random.normal(k2, (c,))
    mean = 0.1 * jax.random.normal(k3, (c,))
    var = jnp.abs(jax.random.normal(k4, (c,))) + 0.5
    scale = gamma / jnp.sqrt(var + 1e-5)
    shift = beta - mean * scale
    return scale.astype(jnp.float32), shift.astype(jnp.float32)


def _conv_init(key, co, ci, k):
    fan = k * k * co
    return (jax.random.normal(key, (co, ci, k, k)) * jnp.sqrt(2.0 / fan)).astype(jnp.float32)


def init_basic_block(key, in_p, out_p):
    ks = jax.random.split(key, 5)
    bn1_s, bn1_b = _bn_fold(ks[0], in_p)
    bn2_s, bn2_b = _bn_fold(ks[1], out_p)
    n_pad = _round_up(out_p, 128)

    w1m = _w_to_mat(_conv_init(ks[2], out_p, in_p, 3))      # [9*in_p, out_p]
    w2m = _w_to_mat(_conv_init(ks[3], out_p, out_p, 3))     # [9*out_p, out_p]
    if in_p != out_p:
        # Pre-concatenate the 1x1 shortcut weights along K: conv2 + shortcut in one GEMM.
        wscm = _w_to_mat(_conv_init(ks[4], out_p, in_p, 1))  # [in_p, out_p]
        w2m = jnp.concatenate([w2m, wscm], axis=0)

    return {
        "bn1_scale": bn1_s,
        "bn1_shift": bn1_b,
        "bn2_pack": _pack_bn(bn2_s, bn2_b, n_pad),           # (2, Np) f32, pre-padded
        "w1": _pad_weight(w1m, n_pad),                        # (Kp1, Np) bf16, pre-padded
        "w2": _pad_weight(w2m, n_pad),                        # (Kp2, Np) bf16, pre-padded
    }


def init_network_block(key, nb_layers, in_planes, out_planes):
    keys = jax.random.split(key, nb_layers)
    params = []
    for i in range(int(nb_layers)):
        in_p = in_planes if i == 0 else out_planes
        params.append(init_basic_block(keys[i], in_p, out_planes))
    return tuple(params)


# ---------------------------------------------------------------------------
# Main
# ---------------------------------------------------------------------------

if __name__ == "__main__":
    key = jax.random.PRNGKey(0)
    k_x, k_p = jax.random.split(key)

    # NetworkBlock(nb_layers=2, in_planes=4, out_planes=8, stride=2)
    N, C_in, H, W = 2, 4, 16, 16
    nb_layers, out_planes, stride = 2, 8, 2

    x = jax.random.normal(k_x, (N, C_in, H, W), dtype=jnp.float32)  # NCHW like PyTorch
    params = init_network_block(k_p, nb_layers, C_in, out_planes)

    y = network_block_forward(x, params, stride, C_in, out_planes)
    y = jax.block_until_ready(y)

    expected_shape = (N, out_planes, H // stride, W // stride)
    assert y.shape == expected_shape, (y.shape, expected_shape)
    assert jnp.all(jnp.isfinite(y))
    print("KERNEL_OK")
</pallas_src>

<mosaic_0001>
module attributes {stable_mosaic.version = 11 : i64} {
  func.func @_fused_mm_kernel(%arg0: i32, %arg1: memref<128x128xbf16, #tpu.memory_space<vmem>>, %arg2: memref<128x128xbf16, #tpu.memory_space<vmem>>, %arg3: memref<2x128xf32, #tpu.memory_space<vmem>>, %arg4: memref<128x128xbf16, #tpu.memory_space<vmem>>) attributes {dimension_semantics = [#tpu.dimension_semantics<parallel>], iteration_bounds = array<i64: 1>, scalar_prefetch = 0 : i64, scratch_operands = 0 : i64, tpu.core_type = #tpu.core_type<tc>, window_params = [{transform_indices = @transform_0, window_bounds = array<i64: 128, 128>}, {pipeline_mode = #tpu.pipeline_mode<synchronous>, transform_indices = @transform_1, window_bounds = array<i64: 128, 128>}, {pipeline_mode = #tpu.pipeline_mode<synchronous>, transform_indices = @transform_2, window_bounds = array<i64: 2, 128>}, {transform_indices = @transform_3, window_bounds = array<i64: 128, 128>}]} {
    %c0 = arith.constant 0 : index
    %c0_0 = arith.constant 0 : index
    %0 = vector.load %arg1[%c0, %c0_0] : memref<128x128xbf16, #tpu.memory_space<vmem>>, vector<128x128xbf16>
    %c0_1 = arith.constant 0 : index
    %c0_2 = arith.constant 0 : index
    %1 = vector.load %arg2[%c0_1, %c0_2] : memref<128x128xbf16, #tpu.memory_space<vmem>>, vector<128x128xbf16>
    %cst = arith.constant dense<0.000000e+00> : vector<128x128xf32>
    %2 = tpu.matmul %0, %1, %cst {dimension_numbers = #tpu.dot_dimension_numbers<[1], [0], [0], [1], [0, 0, 1, 1], [], []>} : vector<128x128xbf16>, vector<128x128xbf16>, vector<128x128xf32> -> vector<128x128xf32>
    %c0_3 = arith.constant 0 : index
    %c0_4 = arith.constant 0 : index
    %3 = vector.load %arg3[%c0_3, %c0_4] : memref<2x128xf32, #tpu.memory_space<vmem>>, vector<1x128xf32>
    %4 = vector.broadcast %3 : vector<1x128xf32> to vector<128x128xf32>
    %5 = arith.mulf %2, %4 : vector<128x128xf32>
    %c1 = arith.constant 1 : index
    %c0_5 = arith.constant 0 : index
    %6 = vector.load %arg3[%c1, %c0_5] : memref<2x128xf32, #tpu.memory_space<vmem>>, vector<1x128xf32>
    %7 = vector.broadcast %6 : vector<1x128xf32> to vector<128x128xf32>
    %8 = arith.addf %5, %7 : vector<128x128xf32>
    %cst_6 = arith.constant 0.000000e+00 : f32
    %9 = vector.broadcast %cst_6 : f32 to vector<128x128xf32>
    %10 = arith.maximumf %8, %9 : vector<128x128xf32>
    %11 = arith.truncf %10 : vector<128x128xf32> to vector<128x128xbf16>
    %c0_7 = arith.constant 0 : index
    %c0_8 = arith.constant 0 : index
    %12 = vector.load %arg4[%c0_7, %c0_8] : memref<128x128xbf16, #tpu.memory_space<vmem>>, vector<128x128xbf16>
    tpu.vector_store %arg4[%c0_7, %c0_8], %11 {strides = array<i32>} : memref<128x128xbf16, #tpu.memory_space<vmem>>, vector<128x128xbf16>,
    return
  }
  func.func @transform_0(%arg0: i32) -> (i32, i32) {
    %c0_i32 = arith.constant 0 : i32
    %c0_i32_0 = arith.constant 0 : i32
    return %arg0, %c0_i32 : i32, i32
  }
  func.func @transform_1(%arg0: i32) -> (i32, i32) {
    %c0_i32 = arith.constant 0 : i32
    %c0_i32_0 = arith.constant 0 : i32
    %c0_i32_1 = arith.constant 0 : i32
    return %c0_i32, %c0_i32_0 : i32, i32
  }
  func.func @transform_2(%arg0: i32) -> (i32, i32) {
    %c0_i32 = arith.constant 0 : i32
    %c0_i32_0 = arith.constant 0 : i32
    %c0_i32_1 = arith.constant 0 : i32
    return %c0_i32, %c0_i32_0 : i32, i32
  }
  func.func @transform_3(%arg0: i32) -> (i32, i32) {
    %c0_i32 = arith.constant 0 : i32
    %c0_i32_0 = arith.constant 0 : i32
    return %arg0, %c0_i32 : i32, i32
  }
}

module attributes {stable_mosaic.version = 11 : i64} {
  func.func @_fused_mm_kernel(%arg0: i32, %arg1: memref<128x128xbf16, #tpu.memory_space<vmem>>, %arg2: memref<128x128xbf16, #tpu.memory_space<vmem>>, %arg3: memref<128x128xf32, #tpu.memory_space<vmem>>) attributes {dimension_semantics = [#tpu.dimension_semantics<parallel>], iteration_bounds = array<i64: 1>, scalar_prefetch = 0 : i64, scratch_operands = 0 : i64, tpu.core_type = #tpu.core_type<tc>, window_params = [{transform_indices = @transform_0, window_bounds = array<i64: 128, 128>}, {pipeline_mode = #tpu.pipeline_mode<synchronous>, transform_indices = @transform_1, window_bounds = array<i64: 128, 128>}, {transform_indices = @transform_2, window_bounds = array<i64: 128, 128>}]} {
    %c0 = arith.constant 0 : index
    %c0_0 = arith.constant 0 : index
    %0 = vector.load %arg1[%c0, %c0_0] : memref<128x128xbf16, #tpu.memory_space<vmem>>, vector<128x128xbf16>
    %c0_1 = arith.constant 0 : index
    %c0_2 = arith.constant 0 : index
    %1 = vector.load %arg2[%c0_1, %c0_2] : memref<128x128xbf16, #tpu.memory_space<vmem>>, vector<128x128xbf16>
    %cst = arith.constant dense<0.000000e+00> : vector<128x128xf32>
    %2 = tpu.matmul %0, %1, %cst {dimension_numbers = #tpu.dot_dimension_numbers<[1], [0], [0], [1], [0, 0, 1, 1], [], []>} : vector<128x128xbf16>, vector<128x128xbf16>, vector<128x128xf32> -> vector<128x128xf32>
    %c0_3 = arith.constant 0 : index
    %c0_4 = arith.constant 0 : index
    %3 = vector.load %arg3[%c0_3, %c0_4] : memref<128x128xf32, #tpu.memory_space<vmem>>, vector<128x128xf32>
    tpu.vector_store %arg3[%c0_3, %c0_4], %2 {strides = array<i32>} : memref<128x128xf32, #tpu.memory_space<vmem>>, vector<128x128xf32>,
    return
  }
  func.func @transform_0(%arg0: i32) -> (i32, i32) {
    %c0_i32 = arith.constant 0 : i32
    %c0_i32_0 = arith.constant 0 : i32
    return %arg0, %c0_i32 : i32, i32
  }
  func.func @transform_1(%arg0: i32) -> (i32, i32) {
    %c0_i32 = arith.constant 0 : i32
    %c0_i32_0 = arith.constant 0 : i32
    %c0_i32_1 = arith.constant 0 : i32
    return %c0_i32, %c0_i32_0 : i32, i32
  }
  func.func @transform_2(%arg0: i32) -> (i32, i32) {
    %c0_i32 = arith.constant 0 : i32
    %c0_i32_0 = arith.constant 0 : i32
    return %arg0, %c0_i32 : i32, i32
  }
}

module attributes {stable_mosaic.version = 11 : i64} {
  func.func @_fused_mm_kernel(%arg0: i32, %arg1: memref<128x128xbf16, #tpu.memory_space<vmem>>, %arg2: memref<128x128xbf16, #tpu.memory_space<vmem>>, %arg3: memref<128x128xbf16, #tpu.memory_space<vmem>>, %arg4: memref<128x128xf32, #tpu.memory_space<vmem>>) attributes {dimension_semantics = [#tpu.dimension_semantics<parallel>], iteration_bounds = array<i64: 1>, scalar_prefetch = 0 : i64, scratch_operands = 0 : i64, tpu.core_type = #tpu.core_type<tc>, window_params = [{transform_indices = @transform_0, window_bounds = array<i64: 128, 128>}, {pipeline_mode = #tpu.pipeline_mode<synchronous>, transform_indices = @transform_1, window_bounds = array<i64: 128, 128>}, {transform_indices = @transform_2, window_bounds = array<i64: 128, 128>}, {transform_indices = @transform_3, window_bounds = array<i64: 128, 128>}]} {
    %c0 = arith.constant 0 : index
    %c0_0 = arith.constant 0 : index
    %0 = vector.load %arg1[%c0, %c0_0] : memref<128x128xbf16, #tpu.memory_space<vmem>>, vector<128x128xbf16>
    %c0_1 = arith.constant 0 : index
    %c0_2 = arith.constant 0 : index
    %1 = vector.load %arg2[%c0_1, %c0_2] : memref<128x128xbf16, #tpu.memory_space<vmem>>, vector<128x128xbf16>
    %cst = arith.constant dense<0.000000e+00> : vector<128x128xf32>
    %2 = tpu.matmul %0, %1, %cst {dimension_numbers = #tpu.dot_dimension_numbers<[1], [0], [0], [1], [0, 0, 1, 1], [], []>} : vector<128x128xbf16>, vector<128x128xbf16>, vector<128x128xf32> -> vector<128x128xf32>
    %c0_3 = arith.constant 0 : index
    %c0_4 = arith.constant 0 : index
    %3 = vector.load %arg3[%c0_3, %c0_4] : memref<128x128xbf16, #tpu.memory_space<vmem>>, vector<128x128xbf16>
    %4 = arith.extf %3 : vector<128x128xbf16> to vector<128x128xf32>
    %5 = arith.addf %2, %4 : vector<128x128xf32>
    %c0_5 = arith.constant 0 : index
    %c0_6 = arith.constant 0 : index
    %6 = vector.load %arg4[%c0_5, %c0_6] : memref<128x128xf32, #tpu.memory_space<vmem>>, vector<128x128xf32>
    tpu.vector_store %arg4[%c0_5, %c0_6], %5 {strides = array<i32>} : memref<128x128xf32, #tpu.memory_space<vmem>>, vector<128x128xf32>,
    return
  }
  func.func @transform_0(%arg0: i32) -> (i32, i32) {
    %c0_i32 = arith.constant 0 : i32
    %c0_i32_0 = arith.constant 0 : i32
    return %arg0, %c0_i32 : i32, i32
  }
  func.func @transform_1(%arg0: i32) -> (i32, i32) {
    %c0_i32 = arith.constant 0 : i32
    %c0_i32_0 = arith.constant 0 : i32
    %c0_i32_1 = arith.constant 0 : i32
    return %c0_i32, %c0_i32_0 : i32, i32
  }
  func.func @transform_2(%arg0: i32) -> (i32, i32) {
    %c0_i32 = arith.constant 0 : i32
    %c0_i32_0 = arith.constant 0 : i32
    return %arg0, %c0_i32 : i32, i32
  }
  func.func @transform_3(%arg0: i32) -> (i32, i32) {
    %c0_i32 = arith.constant 0 : i32
    %c0_i32_0 = arith.constant 0 : i32
    return %arg0, %c0_i32 : i32, i32
  }
}

</mosaic_0001>

<bundles_post_ra>
// kernel: network_block_forward.4
= control target key start
LH: loop header
LB: loop body
LE: loop exit
PB: predicated region body
PF: predicated region fallthrough
CT: control target
= control target key end

     0   :  { %s675_s1 = inlined_call_operand.vmem [shape: bf16[128,128], index: 1, kind: input, shape index: {}]   ;;  %s676_s0 = inlined_call_operand.vmem [shape: bf16[128,128], index: 0, kind: input, shape index: {}]   ;;  %s677_s2 = inlined_call_operand.vmem [shape: f32[2,128], index: 2, kind: input, shape index: {}]   ;;  %s678_s3 = inlined_call_operand.vmem [shape: bf16[128,128], index: 3, kind: output, shape index: {}]  }
   0x1   :  { %v543_v0 = vld [vmem:[%s675_s1] sm:$0xff]   ;;  %v544_v1 = vld [vmem:[%s675_s1 + $0x8] sm:$0xff]   ;;  %v545_v2 = vld [vmem:[%s675_s1 + $0x10] sm:$0xff]  }
   0x2   :  { %495 = vmatprep.subr.bf16.mxu0 %v543_v0  ;;  %527 = vmatprep.subr.bf16.mxu1 %v543_v0  ;;  %v546_v3 = vld [vmem:[%s675_s1 + $0x18] sm:$0xff]   ;;  %v551_v4 = vld [vmem:[%s676_s0] sm:$0xff]   ;;  %v548_v7 = vld [vmem:[%s675_s1 + $0x28] sm:$0xff]  }
   0x3   :  { %496 = vmatpush3.bf16.msra.mxu0 %v543_v0  ;;  %535 = vmatpush3.bf16.msra.mxu1 %v543_v0  ;;  %v552_v5 = vld [vmem:[%s676_s0 + $0x20] sm:$0xff]   ;;  %v549_v8 = vld [vmem:[%s675_s1 + $0x30] sm:$0xff]   ;;  %v550_v9 = vld [vmem:[%s675_s1 + $0x38] sm:$0xff]  }
   0x4   :  { %497 = vmatprep.subr.bf16.mxu0 %v544_v1  ;;  %528 = vmatprep.subr.bf16.mxu1 %v544_v1  ;;  %v547_v6 = vld [vmem:[%s675_s1 + $0x20] sm:$0xff]   ;;  %v553_v10 = vld [vmem:[%s676_s0 + $0x8] sm:$0xff]   ;;  %v555_v12 = vld [vmem:[%s676_s0 + $0x10] sm:$0xff]  }
   0x5   :  { %511 = vmatprep.mubr.bf16.mxu0 %v551_v4  ;;  %519 = vmatprep.mubr.bf16.mxu1 %v552_v5  ;;  %v554_v11 = vld [vmem:[%s676_s0 + $0x28] sm:$0xff]   ;;  %v556_v13 = vld [vmem:[%s676_s0 + $0x30] sm:$0xff]   ;;  %v557_v14 = vld [vmem:[%s676_s0 + $0x18] sm:$0xff]  }
   0x6   :  { %v558_v15 = vld [vmem:[%s676_s0 + $0x38] sm:$0xff]   ;;  %v398_v16 = vld [vmem:[%s677_s2] ss:$0 sm:$0xff]  ;;  %v633_v18 = vld [vmem:[%s677_s2 + $0x1] ss:$0 sm:$0xff] }
   0x7   :  { %498 = vmatpush3.bf16.msra.mxu0 %v544_v1  ;;  %536 = vmatpush3.bf16.msra.mxu1 %v544_v1 }
   0x8   :  { %499 = vmatprep.subr.bf16.mxu0 %v545_v2  ;;  %529 = vmatprep.subr.bf16.mxu1 %v545_v2 }
   0xb   :  { %500 = vmatpush3.bf16.msra.mxu0 %v545_v2  ;;  %537 = vmatpush3.bf16.msra.mxu1 %v545_v2 }
   0xc   :  { %501 = vmatprep.subr.bf16.mxu0 %v546_v3  ;;  %530 = vmatprep.subr.bf16.mxu1 %v546_v3 }
   0xf   :  { %502 = vmatpush3.bf16.msra.mxu0 %v546_v3  ;;  %538 = vmatpush3.bf16.msra.mxu1 %v546_v3 }
  0x10   :  { %503 = vmatprep.subr.bf16.mxu0 %v547_v6  ;;  %531 = vmatprep.subr.bf16.mxu1 %v547_v6 }
  0x13   :  { %504 = vmatpush3.bf16.msra.mxu0 %v547_v6  ;;  %539 = vmatpush3.bf16.msra.mxu1 %v547_v6 }
  0x14   :  { %505 = vmatprep.subr.bf16.mxu0 %v548_v7  ;;  %532 = vmatprep.subr.bf16.mxu1 %v548_v7 }
  0x17   :  { %506 = vmatpush3.bf16.msra.mxu0 %v548_v7  ;;  %540 = vmatpush3.bf16.msra.mxu1 %v548_v7 }
  0x18   :  { %507 = vmatprep.subr.bf16.mxu0 %v549_v8  ;;  %533 = vmatprep.subr.bf16.mxu1 %v549_v8 }
  0x1b   :  { %508 = vmatpush3.bf16.msra.mxu0 %v549_v8  ;;  %541 = vmatpush3.bf16.msra.mxu1 %v549_v8 }
  0x1c   :  { %509 = vmatprep.subr.bf16.mxu0 %v550_v9  ;;  %534 = vmatprep.subr.bf16.mxu1 %v550_v9 }
  0x1f   :  { %510 = vmatpush3.bf16.msra.mxu0 %v550_v9  ;;  %542 = vmatpush3.bf16.msra.mxu1 %v550_v9 }
  0x22   :  { %512 = vmatmul.mubr.bf16.vlgmr.msra.gmra.mrb[0].mxu0 %v553_v10  ;;  %520 = vmatmul.mubr.bf16.vlgmr.msra.gmra.mrb[0].mxu1 %v554_v11 }
  0x23   :  { %515 = vmatprep.mubr.bf16.mxu0 %v555_v12  ;;  %523 = vmatprep.mubr.bf16.mxu1 %v556_v13 }
  0x2a   :  { %516 = vmatmul.mubr.bf16.gmra.mrb[4].mxu0 %v557_v14  ;;  %524 = vmatmul.mubr.bf16.gmra.mrb[4].mxu1 %v558_v15 }
  0xf5   :  { %v513_v17 = vpop.f32.mrb[0].mxu0  ;;  %v521_v19 = vpop.f32.mrb[0].mxu1 }
  0xf6   :  { %v247_v20 = vmul.f32 %v513_v17, %v398_v16  ;;  %v255_v21 = vmul.f32 %v521_v19, %v398_v16  ;;  %v177_v22 = vpop.f32.mrb[1].mxu0  ;;  %v209_v23 = vpop.f32.mrb[1].mxu1 }
  0xf7   :  { %v245_v24 = vmul.f32 %v398_v16, %v177_v22  ;;  %v253_v25 = vmul.f32 %v398_v16, %v209_v23  ;;  %v514_v26 = vpop.f32.mrb[2].mxu0  ;;  %v522_v27 = vpop.f32.mrb[2].mxu1 }
  0xf8   :  { %v268_v28 = vadd.f32 %v633_v18, %v247_v20  ;;  %v276_v29 = vadd.f32 %v633_v18, %v255_v21  ;;  %v248_v30 = vmul.f32 %v514_v26, %v398_v16  ;;  %v256_v31 = vmul.f32 %v522_v27, %v398_v16  ;;  %v180_v32 = vpop.f32.mrb[3].mxu0  ;;  %v212_v33 = vpop.f32.mrb[3].mxu1 }
  0xf9   :  { %v266_v34 = vadd.f32 %v633_v18, %v245_v24  ;;  %v274_v35 = vadd.f32 %v633_v18, %v253_v25  ;;  %v246_v36 = vmul.f32 %v398_v16, %v180_v32  ;;  %v254_v37 = vmul.f32 %v398_v16, %v212_v33 }
  0xfa   :  { %v269_v38 = vadd.f32 %v633_v18, %v248_v30  ;;  %v277_v39 = vadd.f32 %v633_v18, %v256_v31  ;;  %v284_v42 = vmax.f32 %v268_v28, 0.0  ;;  %v292_v43 = vmax.f32 %v276_v29, 0.0 }
  0xfb   :  { %v267_v40 = vadd.f32 %v633_v18, %v246_v36  ;;  %v275_v41 = vadd.f32 %v633_v18, %v254_v37  ;;  %v282_v46 = vmax.f32 %v266_v34, 0.0  ;;  %v290_v47 = vmax.f32 %v274_v35, 0.0 }
  0xfc   :  { %v285_v44 = vmax.f32 %v269_v38, 0.0  ;;  %v293_v45 = vmax.f32 %v277_v39, 0.0 }
  0xfd   :  { %v283_v48 = vmax.f32 %v267_v40, 0.0  ;;  %v291_v49 = vmax.f32 %v275_v41, 0.0  ;;  %v517_v50 = vpop.f32.mrb[4].mxu0  ;;  %v525_v51 = vpop.f32.mrb[4].mxu1 }
  0xfe   :  { %v440_v52 = vpack.c.bf16 %v285_v44, %v284_v42  ;;  %v460_v53 = vpack.c.bf16 %v293_v45, %v292_v43  ;;  %v251_v54 = vmul.f32 %v517_v50, %v398_v16  ;;  %v259_v55 = vmul.f32 %v525_v51, %v398_v16  ;;  %v193_v56 = vpop.f32.mrb[5].mxu0  ;;  %v225_v57 = vpop.f32.mrb[5].mxu1 }
  0xff   :  { %v435_v58 = vpack.c.bf16 %v283_v48, %v282_v46  ;;  %v455_v59 = vpack.c.bf16 %v291_v49, %v290_v47  ;;  %v249_v60 = vmul.f32 %v398_v16, %v193_v56  ;;  %v257_v61 = vmul.f32 %v398_v16, %v225_v57  ;;  %v518_v62 = vpop.f32.mrb[6].mxu0  ;;  %v526_v63 = vpop.f32.mrb[6].mxu1 }
 0x100   :  { %472 = vst [vmem:[%s678_s3 + $0x8] sm:$0xff] %v440_v52   ;;  %476 = vst [vmem:[%s678_s3 + $0x28] sm:$0xff] %v460_v53   ;;  %v272_v0 = vadd.f32 %v633_v18, %v251_v54  ;;  %v280_v1 = vadd.f32 %v633_v18, %v259_v55  ;;  %v252_v2 = vmul.f32 %v518_v62, %v398_v16  ;;  %v196_v4 = vpop.f32.mrb[7].mxu0  ;;  %v228_v5 = vpop.f32.mrb[7].mxu1 }
 0x101   :  { %v260_v3 = vmul.f32 %v526_v63, %v398_v16  ;;  %436 = vst [vmem:[%s678_s3] sm:$0xff] %v435_v58   ;;  %475 = vst [vmem:[%s678_s3 + $0x20] sm:$0xff] %v455_v59   ;;  %v270_v6 = vadd.f32 %v633_v18, %v249_v60  ;;  %v278_v7 = vadd.f32 %v633_v18, %v257_v61 }
 0x102   :  { %v250_v8 = vmul.f32 %v398_v16, %v196_v4  ;;  %v258_v9 = vmul.f32 %v398_v16, %v228_v5  ;;  %v273_v10 = vadd.f32 %v633_v18, %v252_v2  ;;  %v288_v14 = vmax.f32 %v272_v0, 0.0 }
 0x103   :  { %v281_v11 = vadd.f32 %v633_v18, %v260_v3  ;;  %v296_v15 = vmax.f32 %v280_v1, 0.0  ;;  %v286_v20 = vmax.f32 %v270_v6, 0.0  ;;  %v294_v21 = vmax.f32 %v278_v7, 0.0 }
 0x104   :  { %v271_v12 = vadd.f32 %v633_v18, %v250_v8  ;;  %v279_v13 = vadd.f32 %v633_v18, %v258_v9  ;;  %v289_v17 = vmax.f32 %v273_v10, 0.0 }
 0x105   :  { %v297_v19 = vmax.f32 %v281_v11, 0.0 }
 0x106   :  { %v287_v22 = vmax.f32 %v271_v12, 0.0  ;;  %v295_v23 = vmax.f32 %v279_v13, 0.0  ;;  %v450_v24 = vpack.c.bf16 %v289_v17, %v288_v14 }
 0x107   :  { %v470_v25 = vpack.c.bf16 %v297_v19, %v296_v15 }
 0x108   :  { %v445_v26 = vpack.c.bf16 %v287_v22, %v286_v20  ;;  %v465_v16 = vpack.c.bf16 %v295_v23, %v294_v21  ;;  %474 = vst [vmem:[%s678_s3 + $0x18] sm:$0xff] %v450_v24  }
 0x109   :  { %478 = vst [vmem:[%s678_s3 + $0x38] sm:$0xff] %v470_v25  }
 0x10a   :  { %473 = vst [vmem:[%s678_s3 + $0x10] sm:$0xff] %v445_v26   ;;  %477 = vst [vmem:[%s678_s3 + $0x30] sm:$0xff] %v465_v16  }

// kernel: network_block_forward.5
= control target key start
LH: loop header
LB: loop body
LE: loop exit
PB: predicated region body
PF: predicated region fallthrough
CT: control target
= control target key end

     0   :  { %s464_s1 = inlined_call_operand.vmem [shape: bf16[128,128], index: 1, kind: input, shape index: {}]   ;;  %s465_s0 = inlined_call_operand.vmem [shape: bf16[128,128], index: 0, kind: input, shape index: {}]   ;;  %s466_s2 = inlined_call_operand.vmem [shape: f32[128,128], index: 2, kind: output, shape index: {}]  }
   0x1   :  { %v337_v0 = vld [vmem:[%s464_s1] sm:$0xff]   ;;  %v338_v1 = vld [vmem:[%s464_s1 + $0x8] sm:$0xff]   ;;  %v339_v2 = vld [vmem:[%s464_s1 + $0x10] sm:$0xff]  }
   0x2   :  { %289 = vmatprep.subr.bf16.mxu0 %v337_v0  ;;  %321 = vmatprep.subr.bf16.mxu1 %v337_v0  ;;  %v340_v3 = vld [vmem:[%s464_s1 + $0x18] sm:$0xff]   ;;  %v345_v4 = vld [vmem:[%s465_s0] sm:$0xff]   ;;  %v342_v7 = vld [vmem:[%s464_s1 + $0x28] sm:$0xff]  }
   0x3   :  { %290 = vmatpush3.bf16.msra.mxu0 %v337_v0  ;;  %329 = vmatpush3.bf16.msra.mxu1 %v337_v0  ;;  %v346_v5 = vld [vmem:[%s465_s0 + $0x20] sm:$0xff]   ;;  %v343_v8 = vld [vmem:[%s464_s1 + $0x30] sm:$0xff]   ;;  %v344_v9 = vld [vmem:[%s464_s1 + $0x38] sm:$0xff]  }
   0x4   :  { %291 = vmatprep.subr.bf16.mxu0 %v338_v1  ;;  %322 = vmatprep.subr.bf16.mxu1 %v338_v1  ;;  %v341_v6 = vld [vmem:[%s464_s1 + $0x20] sm:$0xff]   ;;  %v347_v10 = vld [vmem:[%s465_s0 + $0x8] sm:$0xff]   ;;  %v349_v12 = vld [vmem:[%s465_s0 + $0x10] sm:$0xff]  }
   0x5   :  { %305 = vmatprep.mubr.bf16.mxu0 %v345_v4  ;;  %313 = vmatprep.mubr.bf16.mxu1 %v346_v5  ;;  %v348_v11 = vld [vmem:[%s465_s0 + $0x28] sm:$0xff]   ;;  %v350_v13 = vld [vmem:[%s465_s0 + $0x30] sm:$0xff]   ;;  %v351_v14 = vld [vmem:[%s465_s0 + $0x18] sm:$0xff]  }
   0x6   :  { %v352_v15 = vld [vmem:[%s465_s0 + $0x38] sm:$0xff]  }
   0x7   :  { %292 = vmatpush3.bf16.msra.mxu0 %v338_v1  ;;  %330 = vmatpush3.bf16.msra.mxu1 %v338_v1 }
   0x8   :  { %293 = vmatprep.subr.bf16.mxu0 %v339_v2  ;;  %323 = vmatprep.subr.bf16.mxu1 %v339_v2 }
   0xb   :  { %294 = vmatpush3.bf16.msra.mxu0 %v339_v2  ;;  %331 = vmatpush3.bf16.msra.mxu1 %v339_v2 }
   0xc   :  { %295 = vmatprep.subr.bf16.mxu0 %v340_v3  ;;  %324 = vmatprep.subr.bf16.mxu1 %v340_v3 }
   0xf   :  { %296 = vmatpush3.bf16.msra.mxu0 %v340_v3  ;;  %332 = vmatpush3.bf16.msra.mxu1 %v340_v3 }
  0x10   :  { %297 = vmatprep.subr.bf16.mxu0 %v341_v6  ;;  %325 = vmatprep.subr.bf16.mxu1 %v341_v6 }
  0x13   :  { %298 = vmatpush3.bf16.msra.mxu0 %v341_v6  ;;  %333 = vmatpush3.bf16.msra.mxu1 %v341_v6 }
  0x14   :  { %299 = vmatprep.subr.bf16.mxu0 %v342_v7  ;;  %326 = vmatprep.subr.bf16.mxu1 %v342_v7 }
  0x17   :  { %300 = vmatpush3.bf16.msra.mxu0 %v342_v7  ;;  %334 = vmatpush3.bf16.msra.mxu1 %v342_v7 }
  0x18   :  { %301 = vmatprep.subr.bf16.mxu0 %v343_v8  ;;  %327 = vmatprep.subr.bf16.mxu1 %v343_v8 }
  0x1b   :  { %302 = vmatpush3.bf16.msra.mxu0 %v343_v8  ;;  %335 = vmatpush3.bf16.msra.mxu1 %v343_v8 }
  0x1c   :  { %303 = vmatprep.subr.bf16.mxu0 %v344_v9  ;;  %328 = vmatprep.subr.bf16.mxu1 %v344_v9 }
  0x1f   :  { %304 = vmatpush3.bf16.msra.mxu0 %v344_v9  ;;  %336 = vmatpush3.bf16.msra.mxu1 %v344_v9 }
  0x22   :  { %306 = vmatmul.mubr.bf16.vlgmr.msra.gmra.mrb[0].mxu0 %v347_v10  ;;  %314 = vmatmul.mubr.bf16.vlgmr.msra.gmra.mrb[0].mxu1 %v348_v11 }
  0x23   :  { %309 = vmatprep.mubr.bf16.mxu0 %v349_v12  ;;  %317 = vmatprep.mubr.bf16.mxu1 %v350_v13 }
  0x2a   :  { %310 = vmatmul.mubr.bf16.gmra.mrb[4].mxu0 %v351_v14  ;;  %318 = vmatmul.mubr.bf16.gmra.mrb[4].mxu1 %v352_v15 }
  0xf5   :  { %v307_v16 = vpop.f32.mrb[0].mxu0  ;;  %v315_v17 = vpop.f32.mrb[0].mxu1 }
  0xf6   :  { %239 = vst [vmem:[%s466_s2 + $0x10] sm:$0xff] %v307_v16  ;;  %247 = vst [vmem:[%s466_s2 + $0x50] sm:$0xff] %v315_v17  ;;  %v174_v18 = vpop.f32.mrb[1].mxu0  ;;  %v206_v19 = vpop.f32.mrb[1].mxu1 }
  0xf7   :  { %237 = vst [vmem:[%s466_s2] sm:$0xff] %v174_v18  ;;  %245 = vst [vmem:[%s466_s2 + $0x40] sm:$0xff] %v206_v19  ;;  %v308_v20 = vpop.f32.mrb[2].mxu0  ;;  %v316_v21 = vpop.f32.mrb[2].mxu1 }
  0xf8   :  { %240 = vst [vmem:[%s466_s2 + $0x18] sm:$0xff] %v308_v20  ;;  %248 = vst [vmem:[%s466_s2 + $0x58] sm:$0xff] %v316_v21  ;;  %v177_v22 = vpop.f32.mrb[3].mxu0  ;;  %v209_v23 = vpop.f32.mrb[3].mxu1 }
  0xf9   :  { %238 = vst [vmem:[%s466_s2 + $0x8] sm:$0xff] %v177_v22  ;;  %246 = vst [vmem:[%s466_s2 + $0x48] sm:$0xff] %v209_v23 }
  0xfd   :  { %v311_v24 = vpop.f32.mrb[4].mxu0  ;;  %v319_v25 = vpop.f32.mrb[4].mxu1 }
  0xfe   :  { %243 = vst [vmem:[%s466_s2 + $0x30] sm:$0xff] %v311_v24  ;;  %251 = vst [vmem:[%s466_s2 + $0x70] sm:$0xff] %v319_v25  ;;  %v190_v26 = vpop.f32.mrb[5].mxu0  ;;  %v222_v27 = vpop.f32.mrb[5].mxu1 }
  0xff   :  { %241 = vst [vmem:[%s466_s2 + $0x20] sm:$0xff] %v190_v26  ;;  %249 = vst [vmem:[%s466_s2 + $0x60] sm:$0xff] %v222_v27  ;;  %v312_v28 = vpop.f32.mrb[6].mxu0  ;;  %v320_v29 = vpop.f32.mrb[6].mxu1 }
 0x100   :  { %244 = vst [vmem:[%s466_s2 + $0x38] sm:$0xff] %v312_v28  ;;  %252 = vst [vmem:[%s466_s2 + $0x78] sm:$0xff] %v320_v29  ;;  %v193_v30 = vpop.f32.mrb[7].mxu0  ;;  %v225_v31 = vpop.f32.mrb[7].mxu1 }
 0x101   :  { %242 = vst [vmem:[%s466_s2 + $0x28] sm:$0xff] %v193_v30  ;;  %250 = vst [vmem:[%s466_s2 + $0x68] sm:$0xff] %v225_v31 }

// kernel: network_block_forward.7
= control target key start
LH: loop header
LB: loop body
LE: loop exit
PB: predicated region body
PF: predicated region fallthrough
CT: control target
= control target key end

     0   :  { %s567_s1 = inlined_call_operand.vmem [shape: bf16[128,128], index: 1, kind: input, shape index: {}]   ;;  %s568_s0 = inlined_call_operand.vmem [shape: bf16[128,128], index: 0, kind: input, shape index: {}]   ;;  %s569_s2 = inlined_call_operand.vmem [shape: bf16[128,128], index: 2, kind: input, shape index: {}]   ;;  %s570_s3 = inlined_call_operand.vmem [shape: f32[128,128], index: 3, kind: output, shape index: {}]  }
   0x1   :  { %v411_v0 = vld [vmem:[%s567_s1] sm:$0xff]   ;;  %v412_v1 = vld [vmem:[%s567_s1 + $0x8] sm:$0xff]   ;;  %v413_v2 = vld [vmem:[%s567_s1 + $0x10] sm:$0xff]  }
   0x2   :  { %363 = vmatprep.subr.bf16.mxu0 %v411_v0  ;;  %395 = vmatprep.subr.bf16.mxu1 %v411_v0  ;;  %v414_v3 = vld [vmem:[%s567_s1 + $0x18] sm:$0xff]   ;;  %v419_v4 = vld [vmem:[%s568_s0] sm:$0xff]   ;;  %v416_v7 = vld [vmem:[%s567_s1 + $0x28] sm:$0xff]  }
   0x3   :  { %364 = vmatpush3.bf16.msra.mxu0 %v411_v0  ;;  %403 = vmatpush3.bf16.msra.mxu1 %v411_v0  ;;  %v420_v5 = vld [vmem:[%s568_s0 + $0x20] sm:$0xff]   ;;  %v417_v8 = vld [vmem:[%s567_s1 + $0x30] sm:$0xff]   ;;  %v418_v9 = vld [vmem:[%s567_s1 + $0x38] sm:$0xff]  }
   0x4   :  { %365 = vmatprep.subr.bf16.mxu0 %v412_v1  ;;  %396 = vmatprep.subr.bf16.mxu1 %v412_v1  ;;  %v415_v6 = vld [vmem:[%s567_s1 + $0x20] sm:$0xff]   ;;  %v421_v10 = vld [vmem:[%s568_s0 + $0x8] sm:$0xff]   ;;  %v423_v12 = vld [vmem:[%s568_s0 + $0x10] sm:$0xff]  }
   0x5   :  { %379 = vmatprep.mubr.bf16.mxu0 %v419_v4  ;;  %387 = vmatprep.mubr.bf16.mxu1 %v420_v5  ;;  %v422_v11 = vld [vmem:[%s568_s0 + $0x28] sm:$0xff]   ;;  %v424_v13 = vld [vmem:[%s568_s0 + $0x30] sm:$0xff]   ;;  %v425_v14 = vld [vmem:[%s568_s0 + $0x18] sm:$0xff]  }
   0x6   :  { %v426_v15 = vld [vmem:[%s568_s0 + $0x38] sm:$0xff]   ;;  %v340_v16 = vld [vmem:[%s569_s2 + $0x8] sm:$0xff]   ;;  %v309_v18 = vld [vmem:[%s569_s2] sm:$0xff]  }
   0x7   :  { %366 = vmatpush3.bf16.msra.mxu0 %v412_v1  ;;  %404 = vmatpush3.bf16.msra.mxu1 %v412_v1  ;;  %v344_v17 = vld [vmem:[%s569_s2 + $0x28] sm:$0xff]   ;;  %v343_v19 = vld [vmem:[%s569_s2 + $0x20] sm:$0xff]   ;;  %v314_v20 = vunpack.c.l.bf16 %v340_v16  ;;  %v310_v22 = vunpack.c.l.bf16 %v309_v18  ;;  %v315_v24 = vunpack.c.h.bf16 %v340_v16  ;;  %v311_v28 = vunpack.c.h.bf16 %v309_v18  ;;  %v342_v38 = vld [vmem:[%s569_s2 + $0x18] sm:$0xff]  }
   0x8   :  { %367 = vmatprep.subr.bf16.mxu0 %v413_v2  ;;  %397 = vmatprep.subr.bf16.mxu1 %v413_v2  ;;  %v330_v21 = vunpack.c.l.bf16 %v344_v17  ;;  %v326_v23 = vunpack.c.l.bf16 %v343_v19  ;;  %v331_v25 = vunpack.c.h.bf16 %v344_v17  ;;  %v327_v29 = vunpack.c.h.bf16 %v343_v19  ;;  %v346_v39 = vld [vmem:[%s569_s2 + $0x38] sm:$0xff]   ;;  %v341_v44 = vld [vmem:[%s569_s2 + $0x10] sm:$0xff]  }
   0x9   :  { %v345_v45 = vld [vmem:[%s569_s2 + $0x30] sm:$0xff]   ;;  %v322_v48 = vunpack.c.l.bf16 %v342_v38  ;;  %v338_v49 = vunpack.c.l.bf16 %v346_v39  ;;  %v318_v50 = vunpack.c.l.bf16 %v341_v44  ;;  %v323_v52 = vunpack.c.h.bf16 %v342_v38 }
   0xa   :  { %v334_v51 = vunpack.c.l.bf16 %v345_v45  ;;  %v339_v53 = vunpack.c.h.bf16 %v346_v39  ;;  %v319_v56 = vunpack.c.h.bf16 %v341_v44  ;;  %v335_v57 = vunpack.c.h.bf16 %v345_v45 }
   0xb   :  { %368 = vmatpush3.bf16.msra.mxu0 %v413_v2  ;;  %405 = vmatpush3.bf16.msra.mxu1 %v413_v2 }
   0xc   :  { %369 = vmatprep.subr.bf16.mxu0 %v414_v3  ;;  %398 = vmatprep.subr.bf16.mxu1 %v414_v3 }
   0xf   :  { %370 = vmatpush3.bf16.msra.mxu0 %v414_v3  ;;  %406 = vmatpush3.bf16.msra.mxu1 %v414_v3 }
  0x10   :  { %371 = vmatprep.subr.bf16.mxu0 %v415_v6  ;;  %399 = vmatprep.subr.bf16.mxu1 %v415_v6 }
  0x13   :  { %372 = vmatpush3.bf16.msra.mxu0 %v415_v6  ;;  %407 = vmatpush3.bf16.msra.mxu1 %v415_v6 }
  0x14   :  { %373 = vmatprep.subr.bf16.mxu0 %v416_v7  ;;  %400 = vmatprep.subr.bf16.mxu1 %v416_v7 }
  0x17   :  { %374 = vmatpush3.bf16.msra.mxu0 %v416_v7  ;;  %408 = vmatpush3.bf16.msra.mxu1 %v416_v7 }
  0x18   :  { %375 = vmatprep.subr.bf16.mxu0 %v417_v8  ;;  %401 = vmatprep.subr.bf16.mxu1 %v417_v8 }
  0x1b   :  { %376 = vmatpush3.bf16.msra.mxu0 %v417_v8  ;;  %409 = vmatpush3.bf16.msra.mxu1 %v417_v8 }
  0x1c   :  { %377 = vmatprep.subr.bf16.mxu0 %v418_v9  ;;  %402 = vmatprep.subr.bf16.mxu1 %v418_v9 }
  0x1f   :  { %378 = vmatpush3.bf16.msra.mxu0 %v418_v9  ;;  %410 = vmatpush3.bf16.msra.mxu1 %v418_v9 }
  0x22   :  { %380 = vmatmul.mubr.bf16.vlgmr.msra.gmra.mrb[0].mxu0 %v421_v10  ;;  %388 = vmatmul.mubr.bf16.vlgmr.msra.gmra.mrb[0].mxu1 %v422_v11 }
  0x23   :  { %383 = vmatprep.mubr.bf16.mxu0 %v423_v12  ;;  %391 = vmatprep.mubr.bf16.mxu1 %v424_v13 }
  0x2a   :  { %384 = vmatmul.mubr.bf16.gmra.mrb[4].mxu0 %v425_v14  ;;  %392 = vmatmul.mubr.bf16.gmra.mrb[4].mxu1 %v426_v15 }
  0xf5   :  { %v381_v26 = vpop.f32.mrb[0].mxu0  ;;  %v389_v27 = vpop.f32.mrb[0].mxu1 }
  0xf6   :  { %v218_v30 = vadd.f32 %v381_v26, %v314_v20  ;;  %v250_v31 = vadd.f32 %v389_v27, %v330_v21  ;;  %v209_v32 = vpop.f32.mrb[1].mxu0  ;;  %v241_v33 = vpop.f32.mrb[1].mxu1 }
  0xf7   :  { %v210_v34 = vadd.f32 %v310_v22, %v209_v32  ;;  %v242_v35 = vadd.f32 %v326_v23, %v241_v33  ;;  %v382_v36 = vpop.f32.mrb[2].mxu0  ;;  %v390_v37 = vpop.f32.mrb[2].mxu1 }
  0xf8   :  { %274 = vst [vmem:[%s570_s3 + $0x10] sm:$0xff] %v218_v30  ;;  %282 = vst [vmem:[%s570_s3 + $0x50] sm:$0xff] %v250_v31  ;;  %v221_v40 = vadd.f32 %v382_v36, %v315_v24  ;;  %v253_v41 = vadd.f32 %v390_v37, %v331_v25  ;;  %v212_v42 = vpop.f32.mrb[3].mxu0  ;;  %v244_v43 = vpop.f32.mrb[3].mxu1 }
  0xf9   :  { %272 = vst [vmem:[%s570_s3] sm:$0xff] %v210_v34  ;;  %280 = vst [vmem:[%s570_s3 + $0x40] sm:$0xff] %v242_v35  ;;  %v213_v46 = vadd.f32 %v311_v28, %v212_v42  ;;  %v245_v47 = vadd.f32 %v327_v29, %v244_v43 }
  0xfa   :  { %275 = vst [vmem:[%s570_s3 + $0x18] sm:$0xff] %v221_v40  ;;  %283 = vst [vmem:[%s570_s3 + $0x58] sm:$0xff] %v253_v41 }
  0xfb   :  { %273 = vst [vmem:[%s570_s3 + $0x8] sm:$0xff] %v213_v46  ;;  %281 = vst [vmem:[%s570_s3 + $0x48] sm:$0xff] %v245_v47 }
  0xfd   :  { %v385_v54 = vpop.f32.mrb[4].mxu0  ;;  %v393_v55 = vpop.f32.mrb[4].mxu1 }
  0xfe   :  { %v234_v58 = vadd.f32 %v385_v54, %v322_v48  ;;  %v266_v59 = vadd.f32 %v393_v55, %v338_v49  ;;  %v225_v60 = vpop.f32.mrb[5].mxu0  ;;  %v257_v61 = vpop.f32.mrb[5].mxu1 }
  0xff   :  { %v226_v62 = vadd.f32 %v318_v50, %v225_v60  ;;  %v258_v63 = vadd.f32 %v334_v51, %v257_v61  ;;  %v386_v0 = vpop.f32.mrb[6].mxu0  ;;  %v394_v1 = vpop.f32.mrb[6].mxu1 }
 0x100   :  { %278 = vst [vmem:[%s570_s3 + $0x30] sm:$0xff] %v234_v58  ;;  %286 = vst [vmem:[%s570_s3 + $0x70] sm:$0xff] %v266_v59  ;;  %v237_v2 = vadd.f32 %v386_v0, %v323_v52  ;;  %v269_v3 = vadd.f32 %v394_v1, %v339_v53  ;;  %v228_v4 = vpop.f32.mrb[7].mxu0  ;;  %v260_v5 = vpop.f32.mrb[7].mxu1 }
 0x101   :  { %276 = vst [vmem:[%s570_s3 + $0x20] sm:$0xff] %v226_v62  ;;  %284 = vst [vmem:[%s570_s3 + $0x60] sm:$0xff] %v258_v63  ;;  %v229_v6 = vadd.f32 %v319_v56, %v228_v4  ;;  %v261_v7 = vadd.f32 %v335_v57, %v260_v5 }
 0x102   :  { %279 = vst [vmem:[%s570_s3 + $0x38] sm:$0xff] %v237_v2  ;;  %287 = vst [vmem:[%s570_s3 + $0x78] sm:$0xff] %v269_v3 }
 0x103   :  { %277 = vst [vmem:[%s570_s3 + $0x28] sm:$0xff] %v229_v6  ;;  %285 = vst [vmem:[%s570_s3 + $0x68] sm:$0xff] %v261_v7 }

</bundles_post_ra>
